<compile_context>
chip_gen: v5e
topology: v5e:2x2
jax: 0.10.0
libtpu: 0.0.40
codegen_flags: <defaults>
</compile_context>

<pallas_src>
import functools

import jax
import jax.numpy as jnp
from jax.experimental import pallas as pl
from jax.experimental.pallas import tpu as pltpu


# --------------------------------------------------------------------------- #
# Kernel
# --------------------------------------------------------------------------- #
def _transition_kernel(x_ref, ss_ref, w_ref, o_ref, *, TB, WP, C2, Cin,
                       Cout_pad, compute_dtype, ew_dtype):
    # x_ref : (TB, WP, 2*Cin)   lanes [0:Cin]  = even column of each column
    #                           pair, lanes [Cin:2*Cin] = odd column
    # ss_ref: (2, 2*Cin)        row 0 = BN scale (duplicated), row 1 = shift
    # w_ref : (Cin, Cout_pad)   1x1 conv weight, transposed, 0.25 pre-folded,
    #                           zero-padded to a lane-dense Cout
    # o_ref : (TB//2, WP, Cout_pad)
    x = x_ref[...].astype(ew_dtype)
    ss = ss_ref[...].astype(ew_dtype)
    scale = ss[0:1, :].reshape(1, 1, C2)
    shift = ss[1:2, :].reshape(1, 1, C2)

    # Fused inference BN + ReLU (VPU; bf16 on v6e/v7x, f32 on v5e).
    xn = jnp.maximum(x * scale + shift, 0.0)                     # (TB, WP, C2)

    # 2x2 sum-pool BEFORE the conv (the 1/4 factor lives in w).
    # Row pairs: split the leading (untiled) axis -> pure view, then reduce.
    xp = xn.reshape(TB // 2, 2, WP, C2).sum(axis=1)              # (TB//2, WP, C2)
    # Column pairs: packed along the lane axis -> lane-slice add on the VPU.
    xp = (xp[..., :Cin] + xp[..., Cin:]).astype(compute_dtype)   # (TB//2, WP, Cin)

    # 1x1 conv == channel matmul on the MXU (f32 accumulation).
    y = jnp.dot(xp.reshape((TB // 2) * WP, Cin), w_ref[...],
                preferred_element_type=jnp.float32)              # (M, Cout_pad)
    o_ref[...] = y.reshape(TB // 2, WP, Cout_pad).astype(o_ref.dtype)


# --------------------------------------------------------------------------- #
# Generation-aware sizing helpers
# --------------------------------------------------------------------------- #
def _vmem_capacity_bytes():
    try:
        return int(pltpu.get_tpu_info().vmem_capacity_bytes)
    except Exception:
        return 64 << 20  # conservative (v7x per-TensorCore VMEM)


def _default_ew_dtype(compute_dtype):
    """bf16 elementwise where the VALU has a bf16 path (v6e/v7x); f32 otherwise."""
    if jnp.dtype(compute_dtype) == jnp.dtype(jnp.float32):
        return jnp.float32
    try:
        kind = jax.devices()[0].device_kind.lower()
    except Exception:
        kind = ""
    if any(g in kind for g in ("v2", "v3", "v4", "v5")):
        return jnp.float32  # no bf16 VALU path on these generations
    return jnp.bfloat16


def _per_step_vmem_bytes(TB, WP, C2, Cout_pad, in_isz, out_isz, ew_isz):
    in_blk = TB * WP * C2 * in_isz
    out_blk = (TB // 2) * WP * Cout_pad * out_isz
    # In-kernel intermediates: xn (TB,WP,C2) + xp (TB//2,WP,C2) in the
    # elementwise dtype, plus the f32 matmul result.
    interm = (TB * WP * C2 + (TB // 2) * WP * C2) * ew_isz \
             + (TB // 2) * WP * Cout_pad * 4
    # Input and output blocks are double-buffered by the pipeline.
    return 2 * in_blk + 2 * out_blk + interm


def _pick_block_rows(R, WP, C2, Cout_pad, in_isz, out_isz, ew_isz,
                     vmem_budget, min_steps=4):
    """Largest even divisor of R fitting the VMEM budget with >= min_steps steps."""
    cands = [tb for tb in range(2, R + 1, 2) if R % tb == 0]
    fits = [tb for tb in cands
            if _per_step_vmem_bytes(tb, WP, C2, Cout_pad,
                                    in_isz, out_isz, ew_isz) <= vmem_budget]
    if not fits:
        fits = cands[:1]
    # Keep enough grid steps for v7x's two TensorCores and pipeline overlap;
    # relax only when the whole problem is too small.
    stepped = [tb for tb in fits if R // tb >= min_steps]
    return max(stepped) if stepped else max(fits)


# --------------------------------------------------------------------------- #
# Wrappers
# --------------------------------------------------------------------------- #
def transition_forward_nhwc(x_nhwc, gamma, beta, running_mean, running_var,
                            conv_w, eps=1e-5, *, compute_dtype=jnp.bfloat16,
                            ew_dtype=None, block_rows=None):
    """Channels-last (NHWC) entry point — no layout transposes.

    x_nhwc: (N, H, W, Cin) f32 or bf16; conv_w: (Cout, Cin, 1, 1) as in PyTorch.
    Returns (N, H//2, W//2, Cout) in x_nhwc.dtype (inference-mode BN only).
    """
    N, H, W, Cin = x_nhwc.shape
    Cout = conv_w.shape[0]
    # TODO(synk): odd H/W (PyTorch avg_pool2d would floor them) are unsupported.
    assert H % 2 == 0 and W % 2 == 0
    WP, C2 = W // 2, 2 * Cin
    R = N * H

    if ew_dtype is None:
        ew_dtype = _default_ew_dtype(compute_dtype)

    # Fold BN (inference) into per-channel scale/shift, duplicated across the
    # two lane-packed pool columns; single (2, 2*Cin) f32 operand.
    scale = (gamma.astype(jnp.float32)
             / jnp.sqrt(running_var.astype(jnp.float32) + eps))
    shift = beta.astype(jnp.float32) - running_mean.astype(jnp.float32) * scale
    ss = jnp.stack([jnp.concatenate([scale, scale]),
                    jnp.concatenate([shift, shift])])             # (2, 2*Cin)

    # 1x1 conv weight -> (Cin, Cout) matmul weight, avg-pool 1/4 folded in;
    # zero-pad Cout below 128 so the output block is lane-dense.
    Cout_pad = 128 if Cout < 128 else Cout
    w = (conv_w.reshape(Cout, Cin).T.astype(jnp.float32) * 0.25).astype(compute_dtype)
    if Cout_pad != Cout:
        w = jnp.pad(w, ((0, 0), (0, Cout_pad - Cout)))

    # Free contiguous re-groupings in HBM: adjacent column pairs packed along
    # lanes, batch folded into the row axis.
    x_packed = x_nhwc.reshape(R, WP, C2)

    in_isz = jnp.dtype(x_packed.dtype).itemsize
    out_isz = jnp.dtype(x_nhwc.dtype).itemsize
    ew_isz = jnp.dtype(ew_dtype).itemsize

    cap = _vmem_capacity_bytes()
    vmem_budget = min(cap // 2, 40 << 20)      # per-step footprint target
    if block_rows is None:
        block_rows = _pick_block_rows(R, WP, C2, Cout_pad, in_isz, out_isz,
                                      ew_isz, vmem_budget)
    TB = block_rows
    assert TB % 2 == 0 and R % TB == 0

    per_step = _per_step_vmem_bytes(TB, WP, C2, Cout_pad, in_isz, out_isz, ew_isz)
    vmem_limit = int(max(min(cap - (4 << 20), per_step + (16 << 20)), 32 << 20))

    kernel = functools.partial(_transition_kernel, TB=TB, WP=WP, C2=C2, Cin=Cin,
                               Cout_pad=Cout_pad, compute_dtype=compute_dtype,
                               ew_dtype=ew_dtype)

    flops = 2 * (R // 2) * WP * Cin * Cout_pad
    bytes_accessed = (x_packed.size * in_isz
                      + (R // 2) * WP * Cout_pad * out_isz
                      + ss.size * 4 + w.size * jnp.dtype(compute_dtype).itemsize)

    out = pl.pallas_call(
        kernel,
        out_shape=jax.ShapeDtypeStruct((R // 2, WP, Cout_pad), x_nhwc.dtype),
        grid_spec=pltpu.PrefetchScalarGridSpec(
            num_scalar_prefetch=0,
            grid=(R // TB,),
            in_specs=[
                pl.BlockSpec((TB, WP, C2), lambda i: (i, 0, 0)),
                pl.BlockSpec((2, C2), lambda i: (0, 0)),
                pl.BlockSpec((Cin, Cout_pad), lambda i: (0, 0)),
            ],
            out_specs=pl.BlockSpec((TB // 2, WP, Cout_pad), lambda i: (i, 0, 0)),
        ),
        compiler_params=pltpu.CompilerParams(
            dimension_semantics=("parallel",),
            vmem_limit_bytes=vmem_limit),
        cost_estimate=pl.CostEstimate(flops=int(flops), transcendentals=0,
                                      bytes_accessed=int(bytes_accessed)),
    )(x_packed, ss, w)

    out = out.reshape(N, H // 2, WP, Cout_pad)
    if Cout_pad != Cout:
        out = out[..., :Cout]
    return out


def transition_forward(x_nchw, gamma, beta, running_mean, running_var, conv_w,
                       eps=1e-5, *, compute_dtype=jnp.bfloat16, ew_dtype=None,
                       block_rows=None):
    """NCHW compatibility wrapper matching the PyTorch module layout.

    NOTE: each transpose here is a full HBM round-trip of the kernel's own
    input/output; in a real model keep activations channels-last end-to-end
    and call transition_forward_nhwc directly.
    """
    x_nhwc = jnp.transpose(x_nchw, (0, 2, 3, 1))
    out_nhwc = transition_forward_nhwc(x_nhwc, gamma, beta, running_mean,
                                       running_var, conv_w, eps,
                                       compute_dtype=compute_dtype,
                                       ew_dtype=ew_dtype,
                                       block_rows=block_rows)
    return jnp.transpose(out_nhwc, (0, 3, 1, 2))


def _reference(x_nchw, gamma, beta, running_mean, running_var, conv_w, eps=1e-5):
    # Plain-JAX reference mirroring the PyTorch module (eval-mode BN).
    inv = gamma / jnp.sqrt(running_var + eps)
    scale = inv[None, :, None, None]
    shift = (beta - running_mean * inv)[None, :, None, None]
    y = jnp.maximum(x_nchw * scale + shift, 0.0)
    w = conv_w.reshape(conv_w.shape[0], conv_w.shape[1])
    y = jnp.einsum("nchw,oc->nohw", y, w)
    N, Co, H, W = y.shape
    return y.reshape(N, Co, H // 2, 2, W // 2, 2).mean(axis=(3, 5))


if __name__ == "__main__":
    key = jax.random.PRNGKey(0)
    N, Cin, H, W = 2, 4, 16, 16
    Cout = 2  # DenseNet transitions typically reduce channel count

    kx, kw, kg, kb, km, kv = jax.random.split(key, 6)
    x = jax.random.normal(kx, (N, Cin, H, W), dtype=jnp.float32)

    gamma = 1.0 + 0.1 * jax.random.normal(kg, (Cin,), dtype=jnp.float32)
    beta = 0.1 * jax.random.normal(kb, (Cin,), dtype=jnp.float32)
    running_mean = 0.1 * jax.random.normal(km, (Cin,), dtype=jnp.float32)
    running_var = jnp.abs(1.0 + 0.1 * jax.random.normal(kv, (Cin,), dtype=jnp.float32))
    conv_w = (jax.random.normal(kw, (Cout, Cin, 1, 1), dtype=jnp.float32)
              * (1.0 / jnp.sqrt(Cin)))

    ref = _reference(x, gamma, beta, running_mean, running_var, conv_w)

    # 1) Strict check: full f32 path; block_rows=8 -> 4 grid steps over N*H.
    out_f32 = transition_forward(x, gamma, beta, running_mean, running_var,
                                 conv_w, compute_dtype=jnp.float32,
                                 block_rows=8)
    out_f32 = jax.block_until_ready(out_f32)
    assert out_f32.shape == (N, Cout, H // 2, W // 2), out_f32.shape
    assert jnp.allclose(out_f32, ref, atol=1e-4, rtol=1e-4), \
        float(jnp.max(jnp.abs(out_f32 - ref)))

    # 2) Fast path (default): bf16 matmul operands, bf16 elementwise prologue
    #    on v6e/v7x (f32 on v5e), auto block sizing.
    out_bf = jax.block_until_ready(
        transition_forward(x, gamma, beta, running_mean, running_var, conv_w))
    assert out_bf.shape == (N, Cout, H // 2, W // 2), out_bf.shape
    assert jnp.allclose(out_bf, ref, atol=1e-1, rtol=1e-1), \
        float(jnp.max(jnp.abs(out_bf - ref)))

    # 3) bf16 activations in / bf16 out (the big HBM-bandwidth lever).
    x_bf16 = x.astype(jnp.bfloat16)
    out_b16 = jax.block_until_ready(
        transition_forward(x_bf16, gamma, beta, running_mean, running_var,
                           conv_w))
    assert out_b16.dtype == jnp.bfloat16
    assert out_b16.shape == (N, Cout, H // 2, W // 2), out_b16.shape
    assert jnp.allclose(out_b16.astype(jnp.float32), ref, atol=1e-1, rtol=1e-1), \
        float(jnp.max(jnp.abs(out_b16.astype(jnp.float32) - ref)))

    print("KERNEL_OK")
</pallas_src>

<mosaic_0001>
module attributes {stable_mosaic.version = 11 : i64} {
  func.func @_transition_kernel(%arg0: i32, %arg1: memref<8x8x8xf32, #tpu.memory_space<vmem>>, %arg2: memref<2x8xf32, #tpu.memory_space<vmem>>, %arg3: memref<4x128xf32, #tpu.memory_space<vmem>>, %arg4: memref<4x8x128xf32, #tpu.memory_space<vmem>>) attributes {dimension_semantics = [#tpu.dimension_semantics<parallel>], iteration_bounds = array<i64: 4>, scalar_prefetch = 0 : i64, scratch_operands = 0 : i64, tpu.core_type = #tpu.core_type<tc>, window_params = [{transform_indices = @transform_0, window_bounds = array<i64: 8, 8, 8>}, {pipeline_mode = #tpu.pipeline_mode<synchronous>, transform_indices = @transform_1, window_bounds = array<i64: 2, 8>}, {pipeline_mode = #tpu.pipeline_mode<synchronous>, transform_indices = @transform_2, window_bounds = array<i64: 4, 128>}, {transform_indices = @transform_3, window_bounds = array<i64: 4, 8, 128>}]} {
    %c0 = arith.constant 0 : index
    %c0_0 = arith.constant 0 : index
    %c0_1 = arith.constant 0 : index
    %0 = vector.load %arg1[%c0, %c0_0, %c0_1] : memref<8x8x8xf32, #tpu.memory_space<vmem>>, vector<8x8x8xf32>
    %c0_2 = arith.constant 0 : index
    %c0_3 = arith.constant 0 : index
    %1 = vector.load %arg2[%c0_2, %c0_3] : memref<2x8xf32, #tpu.memory_space<vmem>>, vector<2x8xf32>
    %2 = vector.extract_strided_slice %1 {offsets = [0, 0], sizes = [1, 8], strides = [1, 1]} : vector<2x8xf32> to vector<1x8xf32>
    %3 = vector.shape_cast %2 : vector<1x8xf32> to vector<1x1x8xf32>
    %4 = vector.extract_strided_slice %1 {offsets = [1, 0], sizes = [1, 8], strides = [1, 1]} : vector<2x8xf32> to vector<1x8xf32>
    %5 = vector.shape_cast %4 : vector<1x8xf32> to vector<1x1x8xf32>
    %6 = vector.broadcast %3 : vector<1x1x8xf32> to vector<8x8x8xf32>
    %7 = arith.mulf %0, %6 : vector<8x8x8xf32>
    %8 = vector.broadcast %5 : vector<1x1x8xf32> to vector<8x8x8xf32>
    %9 = arith.addf %7, %8 : vector<8x8x8xf32>
    %cst = arith.constant 0.000000e+00 : f32
    %10 = vector.broadcast %cst : f32 to vector<8x8x8xf32>
    %11 = arith.maximumf %9, %10 : vector<8x8x8xf32>
    %12 = vector.shape_cast %11 : vector<8x8x8xf32> to vector<4x2x8x8xf32>
    %cst_4 = arith.constant dense<0.000000e+00> : vector<4x8x8xf32>
    %13 = vector.multi_reduction <add>, %12, %cst_4 [1] : vector<4x2x8x8xf32> to vector<4x8x8xf32>
    %14 = vector.extract_strided_slice %13 {offsets = [0, 0, 0], sizes = [4, 8, 4], strides = [1, 1, 1]} : vector<4x8x8xf32> to vector<4x8x4xf32>
    %15 = vector.extract_strided_slice %13 {offsets = [0, 0, 4], sizes = [4, 8, 4], strides = [1, 1, 1]} : vector<4x8x8xf32> to vector<4x8x4xf32>
    %16 = arith.addf %14, %15 : vector<4x8x4xf32>
    %17 = vector.shape_cast %16 : vector<4x8x4xf32> to vector<32x4xf32>
    %c0_5 = arith.constant 0 : index
    %c0_6 = arith.constant 0 : index
    %18 = vector.load %arg3[%c0_5, %c0_6] : memref<4x128xf32, #tpu.memory_space<vmem>>, vector<4x128xf32>
    %cst_7 = arith.constant dense<0.000000e+00> : vector<32x128xf32>
    %19 = tpu.matmul %17, %18, %cst_7 {dimension_numbers = #tpu.dot_dimension_numbers<[1], [0], [0], [1], [0, 0, 1, 1], [], []>} : vector<32x4xf32>, vector<4x128xf32>, vector<32x128xf32> -> vector<32x128xf32>
    %20 = vector.shape_cast %19 : vector<32x128xf32> to vector<4x8x128xf32>
    %c0_8 = arith.constant 0 : index
    %c0_9 = arith.constant 0 : index
    %c0_10 = arith.constant 0 : index
    %21 = vector.load %arg4[%c0_8, %c0_9, %c0_10] : memref<4x8x128xf32, #tpu.memory_space<vmem>>, vector<4x8x128xf32>
    tpu.vector_store %arg4[%c0_8, %c0_9, %c0_10], %20 {strides = array<i32>} : memref<4x8x128xf32, #tpu.memory_space<vmem>>, vector<4x8x128xf32>,
    return
  }
  func.func @transform_0(%arg0: i32) -> (i32, i32, i32) {
    %c0_i32 = arith.constant 0 : i32
    %c0_i32_0 = arith.constant 0 : i32
    %c0_i32_1 = arith.constant 0 : i32
    return %arg0, %c0_i32, %c0_i32_0 : i32, i32, i32
  }
  func.func @transform_1(%arg0: i32) -> (i32, i32) {
    %c0_i32 = arith.constant 0 : i32
    %c0_i32_0 = arith.constant 0 : i32
    %c0_i32_1 = arith.constant 0 : i32
    return %c0_i32, %c0_i32_0 : i32, i32
  }
  func.func @transform_2(%arg0: i32) -> (i32, i32) {
    %c0_i32 = arith.constant 0 : i32
    %c0_i32_0 = arith.constant 0 : i32
    %c0_i32_1 = arith.constant 0 : i32
    return %c0_i32, %c0_i32_0 : i32, i32
  }
  func.func @transform_3(%arg0: i32) -> (i32, i32, i32) {
    %c0_i32 = arith.constant 0 : i32
    %c0_i32_0 = arith.constant 0 : i32
    %c0_i32_1 = arith.constant 0 : i32
    return %arg0, %c0_i32, %c0_i32_0 : i32, i32, i32
  }
}

</mosaic_0001>

<bundles_post_ra>
// kernel: tpu_custom_call.1
= control target key start
LH: loop header
LB: loop body
LE: loop exit
PB: predicated region body
PF: predicated region fallthrough
CT: control target
= control target key end

     0   :  { %8 = vsyncpa [#allocation3], 0  ;;  %s617_s0 = inlined_call_operand.vmem [shape: f32[32,8,8], index: 0, kind: input, shape index: {}]   ;;  %s618_s1 = inlined_call_operand.vmem [shape: f32[2,8], index: 1, kind: input, shape index: {}]   ;;  %s619_s2 = inlined_call_operand.vmem [shape: f32[4,128], index: 2, kind: input, shape index: {}]   ;;  %s620_s3 = inlined_call_operand.hbm [shape: f32[16,8,128], index: 3, kind: output, shape index: {}]  }
   0x1   :  { %10 = vsyncpa [#allocation3 + $0x1], 0  ;;  %s519_s12 = smov 0   ;;  %s521_s13 = smov 0  }
   0x2   :  { %s523_s14 = smov 0   ;;  %s525_s15 = smov 0  }
   0x3 LB: > { %s540_s16 = sadd.s32 4294967295, %s494_s15   ;;  %s369_s17 = sadd.s32 4294967294, %s494_s15   ;;  %s494_s15 = sphi %s525_s15, %s626_s15   ;;  %s490_s14 = sphi %s523_s14, %s625_s14   ;;  %s486_s13 = sphi %s521_s13, %s624_s13   ;;  %s482_s12 = sphi %s519_s12, %s623_s12  }
   0x4   : > { %s544_s18 = sadd.s32 1, %s494_s15   ;;  %s91_s19 = sadd.s32 1, %s490_s14 }
   0x5   : > { %s88_s20 = ssub.s32 %s494_s15, %s544_s18  ;;  %p101_p0 = scmp.ne.s32.totalorder %s490_s14, %s486_s13 }
   0x6   : > { %p89_p1 = scmp.eq.s32.totalorder %s88_s20, 0  ;;  %p102_p2 = scmp.eq.s32.totalorder %s540_s16, 3 }
   0x7   : > { %p107_p3 = scmp.ne.s32.totalorder %s486_s13, %s482_s12  ;;  %p108_p4 = scmp.eq.s32.totalorder %s369_s17, 3 }
   0x8   : > { %s555_s21 = scalar_select %p89_p1, %s490_s14, %s91_s19  }
   0x9   : > { %p557_p5 = por %p102_p2, %p101_p0  ;;  %p561_p6 = por %p108_p4, %p107_p3 }
   0xa   : > { %p372_p7 = scmp.ge.s32.totalorder %s494_s15, 1  ;;  %p141_p8 = scmp.lt.s32.totalorder %s494_s15, 5 }
   0xc   : > { %p142_p9 = pnand %p372_p7, %p141_p8 }
   0xd   : > { %s374_s24 = sshll.u32 (!%p142_p9), %s540_s16, 3  ;;  %s496_s4 = smov (!%p142_p9), 124  }
   0xe   : > { %145 = sbr.rel (%p142_p9) target bundleno = 293 (0x125), region = 32  ;;  %p166_p10 = scmp.lt.s32.totalorder (!%p142_p9), %s374_s24, 31 }
   0xf   : > { %s162_s7 = sand.u32 (!%p142_p9), 1, %s486_s13   ;;  %s386_s10 = sshll.u32 (!%p142_p9), %s540_s16, 5 }
  0x10   : > { %s373_s8 = sshll.u32 (!%p142_p9), %s162_s7, 5  ;;  %s303_s19 = scalar_lea.hbm (!%p142_p9), %s620_s3, %s386_s10 }
  0x11   : > { %s164_s9 = scalar_lea.vmem (!%p142_p9), [#allocation2], %s373_s8  ;;  %s292_s25 = scalar_lea.sflag (!%p142_p9), [#allocation3], %s162_s7 }
  0x12   : > { %s304_s20 = sshll.u32 (!%p142_p9), %s164_s9, 4  ;;  %s452_s29 = scalar_lea.hbm (!%p142_p9), %s620_s3, 128  ;;  %s305_s20 = int_to_ptr.vmem [resolvable:$true] %s304_s20 }
  0x13   : > { %v180_v0 = vld [vmem:[%s618_s1] sm:$0x3]  ;;  %s628_s24 = smov (!%p166_p10, %s374_s24), 31  ;;  %vm207_vm0 = vcmask 64512   ;;  %vm254_vm1 = vcmask 1043456   ;;  %vm241_vm2 = vcmask 31744  }
  0x14   : > { %v181_v1 = vperm.slane %v180_v0, 0  ;;  %s375_s27 = sshll.u32 %s628_s24, 3  ;;  %v190_v2 = vperm.slane %v180_v0, 1  ;;  %v240_v47 = vld [vmem:[%s619_s2] sm:$0xf]  ;;  %s306_s24 = sshll.u32 %s303_s19, 4  ;;  %s307_s24 = int_to_ptr.hbm [resolvable:$true] %s306_s24 }
  0x15   : > { %s169_s30 = scalar_lea.vmem %s617_s0, %s375_s27  ;;  %388 = vmatpush.msk.msra.mxu2 %vm254_vm1, %v240_v47  ;;  %376 = vmatpush.msk.msra.mxu0 %vm254_vm1, %v240_v47  ;;  %s446_s26 = sshra.s32 %s307_s24, 4  ;;  %s447_s26 = int_to_ptr.hbm [resolvable:$true] %s446_s26 }
  0x16   : > { %v176_v3 = vld [vmem:[%s169_s30 + $0x20] sm:$0xff]  ;;  %v177_v4 = vld [vmem:[%s169_s30 + $0x28] sm:$0xff]  ;;  %v178_v10 = vld [vmem:[%s169_s30 + $0x30] sm:$0xff]  ;;  %389 = vmatpush.msk.msra.mxu3 %vm254_vm1, %v240_v47  ;;  %387 = vmatpush.msk.msra.mxu1 %vm254_vm1, %v240_v47  ;;  %s448_s27 = scalar_lea.hbm %s447_s26, 32  ;;  %p453_p0 = scmp.lt.s32.totalorder %s447_s26, %s620_s3 }
  0x17   : > { %v172_v5 = vld [vmem:[%s169_s30] sm:$0xff]  ;;  %v186_v6 = vmul.f32 %v181_v1, %v176_v3  ;;  %v187_v7 = vmul.f32 %v181_v1, %v177_v4  ;;  %v173_v8 = vld [vmem:[%s169_s30 + $0x8] sm:$0xff]  ;;  %v179_v11 = vld [vmem:[%s169_s30 + $0x38] sm:$0xff]  ;;  %v188_v13 = vmul.f32 %v181_v1, %v178_v10  ;;  %p449_p11 = scmp.ne.s32.totalorder %s447_s26, %s448_s27  ;;  %p454_p1 = scmp.lt.s32.totalorder %s452_s29, %s448_s27 }
  0x18   : > { %v182_v9 = vmul.f32 %v181_v1, %v172_v5  ;;  %v183_v12 = vmul.f32 %v181_v1, %v173_v8  ;;  %v189_v14 = vmul.f32 %v181_v1, %v179_v11  ;;  %v174_v15 = vld [vmem:[%s169_s30 + $0x10] sm:$0xff]  ;;  %v175_v16 = vld [vmem:[%s169_s30 + $0x18] sm:$0xff] }
  0x19   : > { %v195_v17 = vadd.f32 %v190_v2, %v186_v6  ;;  %v196_v18 = vadd.f32 %v190_v2, %v187_v7  ;;  %v184_v20 = vmul.f32 %v181_v1, %v174_v15  ;;  %v197_v22 = vadd.f32 %v190_v2, %v188_v13  ;;  %p450_p12 = pnand %p449_p11, %p557_p5  ;;  %p455_p2 = por %p454_p1, %p453_p0 }
  0x1a   : > { %v191_v19 = vadd.f32 %v190_v2, %v182_v9  ;;  %v192_v21 = vadd.f32 %v190_v2, %v183_v12  ;;  %v198_v23 = vadd.f32 %v190_v2, %v189_v14  ;;  %v185_v24 = vmul.f32 %v181_v1, %v175_v16 }
  0x1b   : > { %v203_v25 = vmax.f32 %v195_v17, 0.0  ;;  %v204_v26 = vmax.f32 %v196_v18, 0.0  ;;  %v193_v28 = vadd.f32 %v190_v2, %v184_v20  ;;  %v205_v30 = vmax.f32 %v197_v22, 0.0  ;;  %p451_p13 = pneg %p450_p12 }
  0x1c   : > { %v199_v27 = vmax.f32 %v191_v19, 0.0  ;;  %v200_v29 = vmax.f32 %v192_v21, 0.0  ;;  %v194_v31 = vadd.f32 %v190_v2, %v185_v24  ;;  %v206_v35 = vmax.f32 %v198_v23, 0.0 }
  0x1d   : > { %v214_v32 = vsel %vm207_vm0, %v203_v25, 0.0  ;;  %v215_v33 = vsel %vm207_vm0, %v204_v26, 0.0  ;;  %v201_v38 = vmax.f32 %v193_v28, 0.0  ;;  %v217_v41 = vsel %vm207_vm0, %v205_v30, 0.0  ;;  %p456_p3 = pnand %p455_p2, %p451_p13 }
  0x1e   : > { %v208_v34 = vsel %vm207_vm0, %v199_v27, 0.0  ;;  %v216_v36 = vadd.f32 %v215_v33, %v214_v32  ;;  %v209_v37 = vsel %vm207_vm0, %v200_v29, 0.0  ;;  %v202_v40 = vmax.f32 %v194_v31, 0.0 }
  0x1f   : > { %v210_v39 = vadd.f32 %v209_v37, %v208_v34  ;;  %v218_v42 = vsel %vm207_vm0, %v206_v35, 0.0  ;;  %v211_v43 = vsel %vm207_vm0, %v201_v38, 0.0 }
  0x20   : > { %228 = vrot.lane.b32.xlu0 %v216_v36, %s496_s4  ;;  %v212_v44 = vsel %vm207_vm0, %v202_v40, 0.0  ;;  %v219_v45 = vadd.f32 %v218_v42, %v217_v41 }
  0x21   : > { %224 = vrot.lane.b32.xlu1 %v210_v39, %s496_s4  ;;  %v213_v46 = vadd.f32 %v212_v44, %v211_v43 }
  0x28   : > { %230 = vrot.lane.b32.xlu0 %v219_v45, %s496_s4 }
  0x29   : > { %226 = vrot.lane.b32.xlu1 %v213_v46, %s496_s4 }
  0x92   : > { %v229_v48 = vpop.permute.xlu0 %228 }
  0x93   : > { %v238_v49 = vadd.f32 %v229_v48, %v216_v36  ;;  %v225_v50 = vpop.permute.xlu1 %224 }
  0x94   : > { %v236_v51 = vadd.f32 %v225_v50, %v210_v39 }
  0x95   : > { %379 = vmatmul.msk.f32.vlgmr.msra.gmra.mxu2 %vm241_vm2, %v238_v49 }
  0x96   : > { %377 = vmatmul.msk.f32.vlgmr.msra.gmra.mxu0 %vm241_vm2, %v236_v51 }
  0x9a   : > { %v231_v52 = vpop.permute.xlu0 %230 }
  0x9b   : > { %v239_v53 = vadd.f32 %v231_v52, %v219_v45  ;;  %v227_v54 = vpop.permute.xlu1 %226 }
  0x9c   : > { %v237_v55 = vadd.f32 %v227_v54, %v213_v46 }
  0x9d   : > { %380 = vmatmul.msk.f32.vlgmr.msra.gmra.mxu3 %vm241_vm2, %v239_v53 }
  0x9e   : > { %378 = vmatmul.msk.f32.vlgmr.msra.gmra.mxu1 %vm241_vm2, %v237_v55 }
 0x113   : > { %v275_v56 = vpop.f32.mrf.mxu0 }
 0x114   : > { %287 = vst [vmem:[%s164_s9] sm:$0xff] %v275_v56 }
 0x118   : > { %v281_v57 = vpop.f32.mrf.mxu2 }
 0x119   : > { %289 = vst [vmem:[%s164_s9 + $0x10] sm:$0xff] %v281_v57 }
 0x11b   : > { %v278_v58 = vpop.f32.mrf.mxu1 }
 0x11c   : > { %288 = vst [vmem:[%s164_s9 + $0x8] sm:$0xff] %v278_v58 }
 0x120   : > { %v284_v59 = vpop.f32.mrf.mxu3 }
 0x121   : > { %290 = vst [vmem:[%s164_s9 + $0x18] sm:$0xff] %v284_v59 }
 0x122   : > { %459 = shalt.err (!%p456_p3)
}
 0x123   : > { %s497_s5 = smov 128   ;;  %s498_s6 = smov 8  }
 0x124   : > { %390 = dma.vmem_to_hbm [thread:$0]  (%p557_p5), %s305_s20, 512, %s307_s24, %s292_s25, %s497_s5, %s497_s5, %s498_s6  }
 0x125 PF: > { %p396_p4 = scmp.ge.s32.totalorder %s494_s15, 2  ;;  %s321_s7 = sand.u32 1, %s482_s12  }
 0x126   : > { %s322_s8 = scalar_lea.sflag [#allocation3], %s321_s7 }
 0x127   : > { %p393_p7 = pnand %p396_p4, %p561_p6 }
 0x129   : > { %p394_p8 = pneg %p393_p7 }
 0x12b   : > { %477 = dma.done.wait (%p394_p8), %s322_s8, 512  }
 0x12c   : > { %479 = vsyncadd (%p394_p8), %s322_s8, 4294966784  ;;  %p13_p9 = scmp.ge.s32.totalorder %s544_s18, 6   ;;  %s623_s12 = smov %s486_s13 }
 0x12d   : > { %s624_s13 = smov %s490_s14  ;;  %s625_s14 = smov %s555_s21 }
 0x12e   : > { %s626_s15 = smov %s544_s18  ;;  %15 = sbr.rel (!%p13_p9) target bundleno = 3 (0x3), region = 67 }
 0x133   :  { %328 = vsyncpa [#allocation3], 1 }
 0x134   :  { %330 = vsyncpa [#allocation3 + $0x1], 1 }

</bundles_post_ra>
